<compile_context>
chip_gen: v7x
topology: tpu7x:2x2x1
jax: 0.10.0
libtpu: 0.0.40
codegen_flags: <defaults>
</compile_context>

<pallas_src>
import math

import jax
import jax.numpy as jnp
from jax.experimental import pallas as pl
from jax.experimental.pallas import tpu as pltpu


def _copy_kernel(x_ref, o_ref):
    # Pure lane-dense 2D copy; the flatten was already done (for free) in the
    # wrapper, so in/out blocks have identical shapes -> unmasked vld/vst.
    o_ref[...] = x_ref[...]


def _cdiv(a, b):
    return -(-a // b)


def _round_up(x, m):
    return _cdiv(x, m) * m


def _device_budgets():
    """Generation-aware VMEM budgets (v5e/v6e: 128 MiB, v7x: 64 MiB per TC)."""
    vmem_cap = 0
    try:
        vmem_cap = int(pltpu.get_tpu_info().vmem_capacity_bytes)
    except Exception:
        vmem_cap = 0
    if vmem_cap <= 0:
        vmem_cap = 64 * 1024 * 1024          # conservative: smallest-VMEM gen
    # Scoped limit ~60% of physical VMEM, never above 64 MiB.
    vmem_limit = min(int(vmem_cap * 0.6), 64 * 1024 * 1024)
    # Double-buffered in+out pipeline costs ~4x block bytes; keep ~20% headroom.
    max_block = max(2 * 1024 * 1024, vmem_limit // 5)
    # 64 MiB-per-core VMEM is the signature of the 2-TensorCore generation.
    likely_multi_tc = vmem_cap <= 64 * 1024 * 1024
    return int(vmem_limit), int(max_block), likely_multi_tc


def _pick_tiles(n_lead, flat, itemsize, max_block_bytes, likely_multi_tc):
    """Pick a lane-dense (tb, tf) block; tb is dtype-aware (8/16/32 sublanes)."""
    sublane = max(8, 32 // max(1, itemsize))     # f32:8, bf16:16, int8/fp8:32
    row_bytes = flat * itemsize

    if n_lead * row_bytes <= max_block_bytes:
        tb, tf = n_lead, flat                                     # one block
    elif sublane * row_bytes <= max_block_bytes:
        tf = flat                                                 # full rows
        tb = min(n_lead, (max_block_bytes // row_bytes) // sublane * sublane)
    else:
        tb = n_lead if n_lead < sublane else sublane              # tile flat
        lanes = (max_block_bytes // (tb * itemsize)) // 128 * 128
        tf = max(128, min(lanes, _round_up(flat, 128)))           # never > array

    grid_b = _cdiv(n_lead, tb)
    grid_f = _cdiv(flat, tf)

    # Ensure >=2 grid blocks so the 2-TensorCore generation can shard the copy
    # across both cores; only once the copy is comfortably larger than the
    # ~0.35 us per-grid-step overhead.
    total_bytes = n_lead * row_bytes
    split_threshold = 128 * 1024 if likely_multi_tc else 1024 * 1024
    if grid_b * grid_f == 1 and total_bytes >= split_threshold:
        if n_lead >= 2 * sublane:                                 # split rows
            tb = min(tb, _round_up(_cdiv(n_lead, 2), sublane))
            grid_b = _cdiv(n_lead, tb)
        elif flat % 256 == 0 and flat >= 256:                     # split lanes
            tf = flat // 2
            grid_f = _cdiv(flat, tf)

    return tb, tf, (grid_b, grid_f)


def flatten(x, dim=1, *, use_kernel=True, max_block_bytes=None):
    """PyTorch Flatten(dim).forward: x.view(*x.shape[:dim], -1)."""
    lead_shape = x.shape[:dim]
    n_lead = int(math.prod(lead_shape)) if lead_shape else 1
    flat = int(math.prod(x.shape[dim:])) if x.shape[dim:] else 1
    out_shape = lead_shape + (flat,)

    # Fast path: flatten of a contiguous array is a metadata-only reshape in
    # XLA (zero HBM traffic) -- the right choice in production.
    if not use_kernel or n_lead == 0 or flat == 0:
        return x.reshape(out_shape)

    vmem_limit, auto_block, likely_multi_tc = _device_budgets()
    if max_block_bytes is None:
        max_block_bytes = auto_block

    # Do the flatten in the wrapper (free), so the kernel is a pure copy.
    x2 = x.reshape(n_lead, flat)
    itemsize = jnp.dtype(x.dtype).itemsize
    tb, tf, grid = _pick_tiles(n_lead, flat, itemsize, max_block_bytes,
                               likely_multi_tc)

    out = pl.pallas_call(
        _copy_kernel,
        out_shape=jax.ShapeDtypeStruct((n_lead, flat), x.dtype),
        grid_spec=pltpu.PrefetchScalarGridSpec(
            num_scalar_prefetch=0,
            grid=grid,
            in_specs=[pl.BlockSpec((tb, tf), lambda i, j: (i, j))],
            out_specs=pl.BlockSpec((tb, tf), lambda i, j: (i, j)),
        ),
        compiler_params=pltpu.CompilerParams(
            # Independent axes: shards across both TCs on the 2-core
            # generation; no-op on single-TC chips.
            dimension_semantics=("parallel", "parallel"),
            vmem_limit_bytes=vmem_limit,
        ),
    )(x2)

    return out.reshape(out_shape)


if __name__ == "__main__":
    key = jax.random.PRNGKey(0)
    k1, k2, k3, k4 = jax.random.split(key, 4)

    # 1) Canonical NCHW use: Flatten(dim=1) on (N, C, H, W).
    x = jax.random.normal(k1, (2, 4, 16, 16), dtype=jnp.float32)
    y = flatten(x, dim=1, use_kernel=True)
    jax.block_until_ready(y)
    assert y.shape == (2, 4 * 16 * 16), y.shape
    assert jnp.array_equal(y, x.reshape(2, -1)), "mismatch vs reference flatten"

    # 2) Tiled flat-dim path (small block budget forces a multi-step grid).
    x2 = jax.random.normal(k2, (4, 8, 32, 128), dtype=jnp.float32)
    y2 = flatten(x2, dim=1, use_kernel=True, max_block_bytes=64 * 1024)
    jax.block_until_ready(y2)
    assert y2.shape == (4, 8 * 32 * 128), y2.shape
    assert jnp.array_equal(y2, x2.reshape(4, -1)), "tiled-path mismatch"

    # 3) bf16: dtype-aware 16-row sublane tiles along the batch axis.
    x3 = jax.random.normal(k3, (32, 8, 16, 16), jnp.float32).astype(jnp.bfloat16)
    y3 = flatten(x3, dim=1, use_kernel=True, max_block_bytes=64 * 1024)
    jax.block_until_ready(y3)
    assert y3.shape == (32, 8 * 16 * 16), y3.shape
    assert jnp.array_equal(y3, x3.reshape(32, -1)), "bf16-path mismatch"

    # 4) dim=2 keeps leading dims; ~1 MiB copy exercises the forced >=2-block
    #    split along the batch axis (2-TensorCore sharding path).
    x4 = jax.random.normal(k4, (8, 8, 64, 64), dtype=jnp.float32)
    y4 = flatten(x4, dim=2, use_kernel=True)
    jax.block_until_ready(y4)
    assert y4.shape == (8, 8, 64 * 64), y4.shape
    assert jnp.array_equal(y4, x4.reshape(8, 8, -1)), "dim=2 mismatch"

    print("KERNEL_OK")
</pallas_src>

<mosaic_0001>
module attributes {stable_mosaic.version = 11 : i64} {
  func.func @_copy_kernel(%arg0: i32, %arg1: i32, %arg2: memref<2x1024xf32, #tpu.memory_space<vmem>>, %arg3: memref<2x1024xf32, #tpu.memory_space<vmem>>) attributes {dimension_semantics = [#tpu.dimension_semantics<parallel>, #tpu.dimension_semantics<parallel>], iteration_bounds = array<i64: 1, 1>, scalar_prefetch = 0 : i64, scratch_operands = 0 : i64, tpu.core_type = #tpu.core_type<tc>, window_params = [{transform_indices = @transform_0, window_bounds = array<i64: 2, 1024>}, {transform_indices = @transform_1, window_bounds = array<i64: 2, 1024>}]} {
    %c0 = arith.constant 0 : index
    %c0_0 = arith.constant 0 : index
    %0 = vector.load %arg2[%c0, %c0_0] : memref<2x1024xf32, #tpu.memory_space<vmem>>, vector<2x1024xf32>
    %c0_1 = arith.constant 0 : index
    %c0_2 = arith.constant 0 : index
    %1 = vector.load %arg3[%c0_1, %c0_2] : memref<2x1024xf32, #tpu.memory_space<vmem>>, vector<2x1024xf32>
    tpu.vector_store %arg3[%c0_1, %c0_2], %0 {strides = array<i32>} : memref<2x1024xf32, #tpu.memory_space<vmem>>, vector<2x1024xf32>,
    return
  }
  func.func @transform_0(%arg0: i32, %arg1: i32) -> (i32, i32) {
    %c0_i32 = arith.constant 0 : i32
    return %arg0, %arg1 : i32, i32
  }
  func.func @transform_1(%arg0: i32, %arg1: i32) -> (i32, i32) {
    %c0_i32 = arith.constant 0 : i32
    return %arg0, %arg1 : i32, i32
  }
}

</mosaic_0001>

<bundles_post_ra>
// kernel: tpu_custom_call.1
= control target key start
LH: loop header
LB: loop body
LE: loop exit
PB: predicated region body
PF: predicated region fallthrough
CT: control target
= control target key end

     0   :  { %6 = vsyncpa [#allocation3], 0  ;;  %s126_s0 = inlined_call_operand.hbm [shape: f32[2,1024], index: 0, kind: input, shape index: {}]   ;;  %s127_s1 = inlined_call_operand.hbm [shape: f32[2,1024], index: 1, kind: output, shape index: {}]  }
   0x1   :  { %7 = vsyncpa [#allocation4], 0  ;;  %s90_s6 = smov [#allocation2]   ;;  %s42_s10 = scalar_lea.hbm %s126_s0, 256 }
   0x2   :  { %s14_s7 = sshll.u32 %s90_s6, 4  ;;  %p43_p0 = scmp.ne.s32.totalorder %s126_s0, %s42_s10  ;;  %s15_s7 = int_to_ptr.vmem [resolvable:$true] %s14_s7 }
   0x3   :  { %p46_p1 = scmp.lt.u32.totalorder %s42_s10, %s126_s0 }
   0x5   :  { %p48_p2 = pnand %p46_p1, %p43_p0 }
   0x7   :  { %51 = shalt.err (!%p48_p2)
}
   0x8   :  { %s52_s15 = scalar_lea.vmem %s15_s7, 256  ;;  %p57_p4 = scmp.lt.s32.totalorder %s15_s7, %s15_s7 }
   0x9   :  { %p53_p3 = scmp.ne.s32.totalorder %s15_s7, %s52_s15  ;;  %p58_p5 = scmp.lt.s32.totalorder %s52_s15, %s52_s15 }
   0xb   :  { %p59_p6 = por %p58_p5, %p57_p4 }
   0xd   :  { %p60_p7 = pnand %p59_p6, %p53_p3 }
   0xf   :  { %63 = shalt.err (!%p60_p7)
}
  0x10   :  { %17 = dma.hbm_to_vmem [thread:$0]  %s126_s0, 256, %s15_s7, [#allocation3]  }
  0x11   :  { %86 = dma.done.wait [#allocation3], 256  }
  0x12   :  { %87 = vsyncadd [#allocation3], 4294967040  ;;  %s91_s18 = smov [#allocation5]   ;;  %v21_v0 = vld [vmem:[#allocation2] sm:$0xff]  ;;  %v22_v1 = vld [vmem:[#allocation2 + $0x8] sm:$0xff] }
  0x13   :  { %s31_s19 = sshll.u32 %s91_s18, 4  ;;  %23 = vst [vmem:[#allocation5] sm:$0xff] %v21_v0  ;;  %24 = vst [vmem:[#allocation5 + $0x8] sm:$0xff] %v22_v1  ;;  %s32_s19 = int_to_ptr.vmem [resolvable:$true] %s31_s19 }
  0x14   :  { %s64_s20 = scalar_lea.vmem %s32_s19, 256  ;;  %p69_p9 = scmp.lt.s32.totalorder %s32_s19, %s32_s19 }
  0x15   :  { %p65_p8 = scmp.ne.s32.totalorder %s32_s19, %s64_s20  ;;  %p70_p10 = scmp.lt.s32.totalorder %s64_s20, %s64_s20 }
  0x17   :  { %p71_p11 = por %p70_p10, %p69_p9 }
  0x19   :  { %p72_p12 = pnand %p71_p11, %p65_p8 }
  0x1b   :  { %75 = shalt.err (!%p72_p12)
}
  0x1c   :  { %s76_s0 = scalar_lea.hbm %s127_s1, 256 }
  0x1d   :  { %p77_p13 = scmp.ne.s32.totalorder %s127_s1, %s76_s0  ;;  %p80_p0 = scmp.lt.u32.totalorder %s76_s0, %s127_s1 }
  0x1f   :  { %p82_p1 = pnand %p80_p0, %p77_p13 }
  0x21   :  { %85 = shalt.err (!%p82_p1)
}
  0x22   :  { %34 = dma.vmem_to_hbm [thread:$0]  %s32_s19, 256, %s127_s1, [#allocation4]  }
  0x23   :  { %88 = dma.done.wait [#allocation4], 256  }
  0x24   :  { %89 = vsyncadd [#allocation4], 4294967040 }
  0x25   :  { %38 = vsyncpa [#allocation3], 1 }
  0x26   :  { %39 = vsyncpa [#allocation4], 1 }

</bundles_post_ra>
